<compile_context>
chip_gen: v7x
topology: tpu7x:2x2x1
jax: 0.10.0
libtpu: 0.0.40
codegen_flags: <defaults>
</compile_context>

<pallas_src>
import functools

import jax
import jax.numpy as jnp
from jax.experimental import pallas as pl
from jax.experimental.pallas import tpu as pltpu

HIDDEN = 100          # logical hidden width (nn.Linear(n_features, 100))
HIDDEN_PAD = 128      # hidden padded to one full 128-lane tile (MXU-native K)
LANE = 128
SUBLANE = 8
MAX_TB = 1024         # max batch-tile rows per grid step
VMEM_BUDGET = 12 * 1024 * 1024   # conservative: fits v5e's 16 MiB scoped default


def _round_up(x, m):
    return ((x + m - 1) // m) * m


def _actor_kernel(n_actions, x_ref, w1_ref, b1_ref, wh_ref, bh_ref, out_ref):
    # Hidden layer: [TB, F] @ [F, 128] + [1, 128]  (no activation, per reference).
    h = jnp.dot(x_ref[...], w1_ref[...],
                preferred_element_type=jnp.float32) + b1_ref[...]

    # Fused heads: one matmul producing [TB, out_lanes]
    #   lanes [0, A)  -> mu pre-activation
    #   lanes [A, 2A) -> sigma pre-activation
    z = jnp.dot(h, wh_ref[...],
                preferred_element_type=jnp.float32) + bh_ref[...]

    lane = jax.lax.broadcasted_iota(jnp.int32, z.shape, 1)
    mu = 2.0 * jnp.tanh(z)
    # Numerically-stable softplus, identical to jax.nn.softplus / PyTorch Softplus.
    sp = jnp.maximum(z, 0.0) + jnp.log1p(jnp.exp(-jnp.abs(z)))
    # Single full-128-lane (unmasked) store.
    out_ref[...] = jnp.where(lane < n_actions, mu, sp)


def pack_actor_params(params, n_features, n_actions):
    """Pad + fuse logical params once into the kernel layout (zero padding)."""
    assert n_actions >= 1
    out_lanes = _round_up(2 * n_actions, LANE)   # 128 for typical PPO heads (A <= 64)

    w1 = jnp.zeros((n_features, HIDDEN_PAD), jnp.float32)
    w1 = w1.at[:, :HIDDEN].set(params["w1"])
    b1 = jnp.zeros((1, HIDDEN_PAD), jnp.float32).at[:, :HIDDEN].set(params["b1"])

    wh = jnp.zeros((HIDDEN_PAD, out_lanes), jnp.float32)
    wh = wh.at[:HIDDEN, :n_actions].set(params["wmu"])
    wh = wh.at[:HIDDEN, n_actions:2 * n_actions].set(params["ws"])
    bh = jnp.zeros((1, out_lanes), jnp.float32)
    bh = bh.at[:, :n_actions].set(params["bmu"])
    bh = bh.at[:, n_actions:2 * n_actions].set(params["bs"])

    return {"w1": w1, "b1": b1, "wh": wh, "bh": bh}


@functools.partial(jax.jit, static_argnames=("n_actions",))
def actor_forward(x, packed, n_actions):
    """Returns (mu, sigma) parameterizing Normal(mu, sigma)."""
    B, F = x.shape
    out_lanes = packed["wh"].shape[1]

    # Batch tiling: >= 2 parallel tiles when batch allows (v7x megacore), tile a
    # multiple of 8 sublanes, capped by MAX_TB and a VMEM budget.
    b8 = _round_up(max(B, 1), SUBLANE)
    tb = min(MAX_TB, max(SUBLANE, _round_up(-(-b8 // 2), SUBLANE)))
    weight_bytes = 2 * 4 * (F * HIDDEN_PAD + HIDDEN_PAD
                            + HIDDEN_PAD * out_lanes + out_lanes)
    avail = max(VMEM_BUDGET - weight_bytes, 1 << 20)
    per_row = 2 * 4 * (F + out_lanes)            # double-buffered bytes per row
    tb = min(tb, max(SUBLANE, (avail // per_row) // SUBLANE * SUBLANE))
    b_pad = _round_up(b8, tb)

    x = x.astype(jnp.float32)
    x_p = x if b_pad == B else jnp.pad(x, ((0, b_pad - B), (0, 0)))

    slab = pl.pallas_call(
        functools.partial(_actor_kernel, n_actions),
        out_shape=jax.ShapeDtypeStruct((b_pad, out_lanes), jnp.float32),
        grid=(b_pad // tb,),
        in_specs=[
            pl.BlockSpec((tb, F), lambda i: (i, 0)),                  # x tile (F unpadded)
            pl.BlockSpec((F, HIDDEN_PAD), lambda i: (0, 0)),          # w1 (resident)
            pl.BlockSpec((1, HIDDEN_PAD), lambda i: (0, 0)),          # b1
            pl.BlockSpec((HIDDEN_PAD, out_lanes), lambda i: (0, 0)),  # fused head weight
            pl.BlockSpec((1, out_lanes), lambda i: (0, 0)),           # fused head bias
        ],
        out_specs=pl.BlockSpec((tb, out_lanes), lambda i: (i, 0)),
        compiler_params=pltpu.CompilerParams(
            dimension_semantics=("parallel",)),
    )(x_p, packed["w1"], packed["b1"], packed["wh"], packed["bh"])

    mu = slab[:B, :n_actions]
    sigma = slab[:B, n_actions:2 * n_actions]
    return mu, sigma
    # TODO(synk): sampling / clipping from choose_action() is a host-side utility,
    # not part of the forward compute, so it is not implemented as a kernel.


def init_actor_params(key, n_features, n_actions):
    """PyTorch nn.Linear default init: U[-1/sqrt(fan_in), +1/sqrt(fan_in)]."""
    def linear(k, fan_in, fan_out):
        kw, kb = jax.random.split(k)
        bound = 1.0 / jnp.sqrt(fan_in)
        w = jax.random.uniform(kw, (fan_in, fan_out), jnp.float32, -bound, bound)
        b = jax.random.uniform(kb, (1, fan_out), jnp.float32, -bound, bound)
        return w, b

    k1, k2, k3 = jax.random.split(key, 3)
    w1, b1 = linear(k1, n_features, HIDDEN)
    wmu, bmu = linear(k2, HIDDEN, n_actions)
    ws, bs = linear(k3, HIDDEN, n_actions)
    return {"w1": w1, "b1": b1, "wmu": wmu, "bmu": bmu, "ws": ws, "bs": bs}


def actor_forward_ref(x, p):
    h = x @ p["w1"] + p["b1"]
    mu = 2.0 * jnp.tanh(h @ p["wmu"] + p["bmu"])
    sigma = jax.nn.softplus(h @ p["ws"] + p["bs"])
    return mu, sigma


if __name__ == "__main__":
    key = jax.random.PRNGKey(0)
    k_param, k_x, k_x2 = jax.random.split(key, 3)

    B, F, A = 4, 16, 4  # batch, n_features, n_actions
    params = init_actor_params(k_param, F, A)
    packed = pack_actor_params(params, F, A)

    x = jax.random.normal(k_x, (B, F), jnp.float32)
    mu, sigma = actor_forward(x, packed, A)
    jax.block_until_ready((mu, sigma))

    mu_ref, sigma_ref = actor_forward_ref(x, params)
    assert mu.shape == (B, A) and sigma.shape == (B, A)
    assert jnp.allclose(mu, mu_ref, atol=1e-5, rtol=1e-5)
    assert jnp.allclose(sigma, sigma_ref, atol=1e-5, rtol=1e-5)
    assert bool(jnp.all(sigma > 0))  # valid Normal scale

    # Exercise the multi-tile / batch-padding path (grid > 1, ragged batch).
    B2 = 20
    x2 = jax.random.normal(k_x2, (B2, F), jnp.float32)
    mu2, sigma2 = actor_forward(x2, packed, A)
    jax.block_until_ready((mu2, sigma2))
    mu2_ref, sigma2_ref = actor_forward_ref(x2, params)
    assert mu2.shape == (B2, A) and sigma2.shape == (B2, A)
    assert jnp.allclose(mu2, mu2_ref, atol=1e-5, rtol=1e-5)
    assert jnp.allclose(sigma2, sigma2_ref, atol=1e-5, rtol=1e-5)
    assert bool(jnp.all(sigma2 > 0))

    print("KERNEL_OK")
</pallas_src>

<mosaic_0001>
module attributes {stable_mosaic.version = 11 : i64} {
  func.func @_actor_kernel(%arg0: i32, %arg1: memref<8x16xf32, #tpu.memory_space<vmem>>, %arg2: memref<16x128xf32, #tpu.memory_space<vmem>>, %arg3: memref<1x128xf32, #tpu.memory_space<vmem>>, %arg4: memref<128x128xf32, #tpu.memory_space<vmem>>, %arg5: memref<1x128xf32, #tpu.memory_space<vmem>>, %arg6: memref<8x128xf32, #tpu.memory_space<vmem>>) attributes {dimension_semantics = [#tpu.dimension_semantics<parallel>], iteration_bounds = array<i64: 1>, scalar_prefetch = 0 : i64, scratch_operands = 0 : i64, tpu.core_type = #tpu.core_type<tc>, window_params = [{transform_indices = @transform_0, window_bounds = array<i64: 8, 16>}, {pipeline_mode = #tpu.pipeline_mode<synchronous>, transform_indices = @transform_1, window_bounds = array<i64: 16, 128>}, {pipeline_mode = #tpu.pipeline_mode<synchronous>, transform_indices = @transform_2, window_bounds = array<i64: 1, 128>}, {pipeline_mode = #tpu.pipeline_mode<synchronous>, transform_indices = @transform_3, window_bounds = array<i64: 128, 128>}, {pipeline_mode = #tpu.pipeline_mode<synchronous>, transform_indices = @transform_4, window_bounds = array<i64: 1, 128>}, {transform_indices = @transform_5, window_bounds = array<i64: 8, 128>}]} {
    %c0 = arith.constant 0 : index
    %c0_0 = arith.constant 0 : index
    %0 = vector.load %arg1[%c0, %c0_0] : memref<8x16xf32, #tpu.memory_space<vmem>>, vector<8x16xf32>
    %c0_1 = arith.constant 0 : index
    %c0_2 = arith.constant 0 : index
    %1 = vector.load %arg2[%c0_1, %c0_2] : memref<16x128xf32, #tpu.memory_space<vmem>>, vector<16x128xf32>
    %cst = arith.constant dense<0.000000e+00> : vector<8x128xf32>
    %2 = tpu.matmul %0, %1, %cst {dimension_numbers = #tpu.dot_dimension_numbers<[1], [0], [0], [1], [0, 0, 1, 1], [], []>} : vector<8x16xf32>, vector<16x128xf32>, vector<8x128xf32> -> vector<8x128xf32>
    %c0_3 = arith.constant 0 : index
    %c0_4 = arith.constant 0 : index
    %3 = vector.load %arg3[%c0_3, %c0_4] : memref<1x128xf32, #tpu.memory_space<vmem>>, vector<1x128xf32>
    %4 = vector.broadcast %3 : vector<1x128xf32> to vector<8x128xf32>
    %5 = arith.addf %2, %4 : vector<8x128xf32>
    %c0_5 = arith.constant 0 : index
    %c0_6 = arith.constant 0 : index
    %6 = vector.load %arg4[%c0_5, %c0_6] : memref<128x128xf32, #tpu.memory_space<vmem>>, vector<128x128xf32>
    %cst_7 = arith.constant dense<0.000000e+00> : vector<8x128xf32>
    %7 = tpu.matmul %5, %6, %cst_7 {dimension_numbers = #tpu.dot_dimension_numbers<[1], [0], [0], [1], [0, 0, 1, 1], [], []>} : vector<8x128xf32>, vector<128x128xf32>, vector<8x128xf32> -> vector<8x128xf32>
    %c0_8 = arith.constant 0 : index
    %c0_9 = arith.constant 0 : index
    %8 = vector.load %arg5[%c0_8, %c0_9] : memref<1x128xf32, #tpu.memory_space<vmem>>, vector<1x128xf32>
    %9 = vector.broadcast %8 : vector<1x128xf32> to vector<8x128xf32>
    %10 = arith.addf %7, %9 : vector<8x128xf32>
    %11 = tpu.iota {dimensions = array<i32: 1>} : vector<8x128xi32>
    %12 = math.tanh %10 : vector<8x128xf32>
    %cst_10 = arith.constant 2.000000e+00 : f32
    %13 = vector.broadcast %cst_10 : f32 to vector<8x128xf32>
    %14 = arith.mulf %13, %12 : vector<8x128xf32>
    %cst_11 = arith.constant 0.000000e+00 : f32
    %15 = vector.broadcast %cst_11 : f32 to vector<8x128xf32>
    %16 = arith.maximumf %10, %15 : vector<8x128xf32>
    %17 = math.absf %10 : vector<8x128xf32>
    %cst_12 = arith.constant 0.000000e+00 : f32
    %18 = vector.broadcast %cst_12 : f32 to vector<8x128xf32>
    %19 = arith.subf %18, %17 : vector<8x128xf32>
    %20 = math.exp %19 : vector<8x128xf32>
    %21 = math.log1p %20 : vector<8x128xf32>
    %22 = arith.addf %16, %21 : vector<8x128xf32>
    %c4_i32 = arith.constant 4 : i32
    %23 = vector.broadcast %c4_i32 : i32 to vector<8x128xi32>
    %24 = arith.cmpi slt, %11, %23 : vector<8x128xi32>
    %25 = arith.select %24, %14, %22 : vector<8x128xi1>, vector<8x128xf32>
    %c0_13 = arith.constant 0 : index
    %c0_14 = arith.constant 0 : index
    %26 = vector.load %arg6[%c0_13, %c0_14] : memref<8x128xf32, #tpu.memory_space<vmem>>, vector<8x128xf32>
    tpu.vector_store %arg6[%c0_13, %c0_14], %25 {strides = array<i32>} : memref<8x128xf32, #tpu.memory_space<vmem>>, vector<8x128xf32>,
    return
  }
  func.func @transform_0(%arg0: i32) -> (i32, i32) {
    %c0_i32 = arith.constant 0 : i32
    %c0_i32_0 = arith.constant 0 : i32
    return %arg0, %c0_i32 : i32, i32
  }
  func.func @transform_1(%arg0: i32) -> (i32, i32) {
    %c0_i32 = arith.constant 0 : i32
    %c0_i32_0 = arith.constant 0 : i32
    %c0_i32_1 = arith.constant 0 : i32
    return %c0_i32, %c0_i32_0 : i32, i32
  }
  func.func @transform_2(%arg0: i32) -> (i32, i32) {
    %c0_i32 = arith.constant 0 : i32
    %c0_i32_0 = arith.constant 0 : i32
    %c0_i32_1 = arith.constant 0 : i32
    return %c0_i32, %c0_i32_0 : i32, i32
  }
  func.func @transform_3(%arg0: i32) -> (i32, i32) {
    %c0_i32 = arith.constant 0 : i32
    %c0_i32_0 = arith.constant 0 : i32
    %c0_i32_1 = arith.constant 0 : i32
    return %c0_i32, %c0_i32_0 : i32, i32
  }
  func.func @transform_4(%arg0: i32) -> (i32, i32) {
    %c0_i32 = arith.constant 0 : i32
    %c0_i32_0 = arith.constant 0 : i32
    %c0_i32_1 = arith.constant 0 : i32
    return %c0_i32, %c0_i32_0 : i32, i32
  }
  func.func @transform_5(%arg0: i32) -> (i32, i32) {
    %c0_i32 = arith.constant 0 : i32
    %c0_i32_0 = arith.constant 0 : i32
    return %arg0, %c0_i32 : i32, i32
  }
}

</mosaic_0001>

<bundles_post_ra>
// kernel: actor_forward.1
= control target key start
LH: loop header
LB: loop body
LE: loop exit
PB: predicated region body
PF: predicated region fallthrough
CT: control target
= control target key end

     0   :  { %10 = vsyncpa [#allocation3], 0  ;;  %s366_s18 = smov [#allocation2]   ;;  %s432_s0 = inlined_call_operand.vmem [shape: f32[8,16], index: 0, kind: input, shape index: {}]   ;;  %s433_s1 = inlined_call_operand.vmem [shape: f32[16,128], index: 1, kind: input, shape index: {}]   ;;  %s434_s2 = inlined_call_operand.vmem [shape: f32[1,128], index: 2, kind: input, shape index: {}]   ;;  %s435_s3 = inlined_call_operand.hbm [shape: f32[128,128], index: 3, kind: input, shape index: {}]   ;;  %s436_s4 = inlined_call_operand.vmem [shape: f32[1,128], index: 4, kind: input, shape index: {}]   ;;  %s437_s5 = inlined_call_operand.vmem [shape: f32[8,128], index: 5, kind: output, shape index: {}]  }
   0x1   :  { %s22_s19 = sshll.u32 %s366_s18, 4  ;;  %s342_s22 = scalar_lea.hbm %s435_s3, 2048  ;;  %s23_s19 = int_to_ptr.vmem [resolvable:$true] %s22_s19 }
   0x2   :  { %p343_p0 = scmp.ne.s32.totalorder %s435_s3, %s342_s22  ;;  %p346_p1 = scmp.lt.u32.totalorder %s342_s22, %s435_s3 }
   0x4   :  { %p348_p2 = pnand %p346_p1, %p343_p0 }
   0x6   :  { %351 = shalt.err (!%p348_p2)
}
   0x7   :  { %s352_s27 = scalar_lea.vmem %s23_s19, 2048  ;;  %p357_p4 = scmp.lt.s32.totalorder %s23_s19, %s23_s19 }
   0x8   :  { %p353_p3 = scmp.ne.s32.totalorder %s23_s19, %s352_s27  ;;  %p358_p5 = scmp.lt.s32.totalorder %s352_s27, %s352_s27 }
   0xa   :  { %p359_p6 = por %p358_p5, %p357_p4 }
   0xc   :  { %p360_p7 = pnand %p359_p6, %p353_p3 }
   0xe   :  { %363 = shalt.err (!%p360_p7)
}
   0xf   :  { %s367_s28 = smov 128   ;;  %s368_s29 = smov 8  }
  0x10   :  { %28 = dma.hbm_to_vmem [thread:$0]  %s435_s3, 2048, %s23_s19, [#allocation3], %s367_s28, %s367_s28, %s368_s29  }
  0x11   :  { %364 = dma.done.wait [#allocation3], 2048  }
  0x12   :  { %365 = vsyncadd [#allocation3], 4294965248  ;;  %v369_v0 = vmov 0.0|0.0   ;;  %vm370_vm0 = vmmov 0   ;;  %v371_v1 = vmov 0.0   ;;  %v35_v2 = vld [vmem:[%s433_s1] sm:$0xff]  ;;  %v211_v44 = vlaneseq }
  0x13   :  { %303 = vmatprep.subr.bf16.mxu0 %v369_v0  ;;  %265 = vmatprep.mubr.msk.f32.mxu0 %vm370_vm0, %v371_v1  ;;  %v36_v3 = vld [vmem:[%s433_s1 + $0x8] sm:$0xff]  ;;  %v118_v5 = vld [vmem:[#allocation2] sm:$0xff]  ;;  %v119_v6 = vld [vmem:[#allocation2 + $0x8] sm:$0xff]  ;;  %vm44_vm1 = vcmask 130048  }
  0x14   :  { %306 = vmatprep.subr.bf16.mxu1 %v369_v0  ;;  %300 = vmatprep.mubr.msk.f32.mxu1 %vm370_vm0, %v371_v1  ;;  %v304_v4 = vpack.c.bf16 %v36_v3, %v35_v2  ;;  %v120_v7 = vld [vmem:[#allocation2 + $0x10] sm:$0xff]  ;;  %v307_v8 = vpack.c.bf16 %v119_v6, %v118_v5  ;;  %v121_v9 = vld [vmem:[#allocation2 + $0x18] sm:$0xff]  ;;  %v122_v12 = vld [vmem:[#allocation2 + $0x20] sm:$0xff]  ;;  %v212_v47 = vand.u32 127, %v211_v44 }
  0x15   :  { %v34_v10 = vld [vmem:[%s432_s0] sm:$0xff]  ;;  %v310_v11 = vpack.c.bf16 %v121_v9, %v120_v7  ;;  %v123_v13 = vld [vmem:[#allocation2 + $0x28] sm:$0xff]  ;;  %v125_v16 = vld [vmem:[#allocation2 + $0x38] sm:$0xff] }
  0x16   :  { %305 = vmatpush3.bf16.msra.mxu0 %v304_v4  ;;  %308 = vmatpush3.bf16.msra.mxu1 %v307_v8  ;;  %v313_v14 = vpack.c.bf16 %v123_v13, %v122_v12  ;;  %v124_v15 = vld [vmem:[#allocation2 + $0x30] sm:$0xff]  ;;  %v126_v18 = vld [vmem:[#allocation2 + $0x40] sm:$0xff]  ;;  %v127_v19 = vld [vmem:[#allocation2 + $0x48] sm:$0xff]  ;;  %vm230_vm3 = vcmp.lt.s32.totalorder %v212_v47, 4 }
  0x17   :  { %309 = vmatprep.subr.bf16.mxu1 %v369_v0  ;;  %v316_v17 = vpack.c.bf16 %v125_v16, %v124_v15  ;;  %v319_v20 = vpack.c.bf16 %v127_v19, %v126_v18  ;;  %v128_v21 = vld [vmem:[#allocation2 + $0x50] sm:$0xff]  ;;  %v129_v22 = vld [vmem:[#allocation2 + $0x58] sm:$0xff]  ;;  %v130_v24 = vld [vmem:[#allocation2 + $0x60] sm:$0xff] }
  0x18   :  { %v322_v23 = vpack.c.bf16 %v129_v22, %v128_v21  ;;  %v131_v25 = vld [vmem:[#allocation2 + $0x68] sm:$0xff]  ;;  %v132_v27 = vld [vmem:[#allocation2 + $0x70] sm:$0xff]  ;;  %v133_v28 = vld [vmem:[#allocation2 + $0x78] sm:$0xff] }
  0x19   :  { %266 = vmatmul.mubr.msk.f32.vlgmr.msra.gmra.mrb[0].mxu0 %vm44_vm1, %v34_v10  ;;  %v325_v26 = vpack.c.bf16 %v131_v25, %v130_v24  ;;  %v328_v29 = vpack.c.bf16 %v133_v28, %v132_v27  ;;  %v238_v30 = vld [vmem:[%s434_s2] ss:$0 sm:$0xff] }
  0x1a   :  { %311 = vmatpush3.bf16.msra.mxu1 %v310_v11  ;;  %v240_v34 = vld [vmem:[%s436_s4] ss:$0 sm:$0xff] }
  0x1b   :  { %312 = vmatprep.subr.bf16.mxu1 %v369_v0 }
  0x1e   :  { %314 = vmatpush3.bf16.msra.mxu1 %v313_v14 }
  0x1f   :  { %315 = vmatprep.subr.bf16.mxu1 %v369_v0 }
  0x22   :  { %317 = vmatpush3.bf16.msra.mxu1 %v316_v17 }
  0x23   :  { %318 = vmatprep.subr.bf16.mxu1 %v369_v0 }
  0x26   :  { %320 = vmatpush3.bf16.msra.mxu1 %v319_v20 }
  0x27   :  { %321 = vmatprep.subr.bf16.mxu1 %v369_v0 }
  0x2a   :  { %323 = vmatpush3.bf16.msra.mxu1 %v322_v23 }
  0x2b   :  { %324 = vmatprep.subr.bf16.mxu1 %v369_v0 }
  0x2e   :  { %326 = vmatpush3.bf16.msra.mxu1 %v325_v26 }
  0x2f   :  { %327 = vmatprep.subr.bf16.mxu1 %v369_v0 }
  0x32   :  { %329 = vmatpush3.bf16.msra.mxu1 %v328_v29 }
  0xec   :  { %v114_v31 = vpop.f32.mrb[0].mxu0 }
  0xed   :  { %v115_v32 = vadd.f32 %v238_v30, %v114_v31  ;;  %v267_v33 = vpop.f32.mrb[1].mxu0 }
  0xef   :  { %301 = vmatmul.mubr.f32.vlgmr.msra.gmra.mrb[0].mxu1 %v115_v32 }
 0x1c2   :  { %v207_v35 = vpop.f32.mrb[0].mxu1 }
 0x1c3   :  { %v208_v36 = vadd.f32 %v240_v34, %v207_v35  ;;  %v302_v37 = vpop.f32.mrb[1].mxu1 }
 0x1c5   :  { %v216_v38 = vand.u32 2147483647, %v208_v36  ;;  %v215_v52 = vmax.f32 %v208_v36, 0.0 }
 0x1c7   :  { %v217_v39 = vsub.f32 0.0, %v216_v38 }
 0x1c9   :  { %v218_v40 = vmul.f32 1.442695, %v217_v39 }
 0x1cb   :  { %336 = vpow2.f32 %v218_v40 }
 0x1d5   :  { %v337_v41 = vpop.eup %336 }
 0x1d6   :  { %v220_v42 = vadd.f32 1.0, %v337_v41  ;;  %v223_v43 = vmul.f32 -0.5, %v337_v41  ;;  %v226_v46 = vand.u32 2147483647, %v337_v41 }
 0x1d8   :  { %338 = vlog2.f32 %v220_v42  ;;  %v224_v45 = vadd.f32 1.0, %v223_v43  ;;  %vm227_vm2 = vcmp.lt.f32.partialorder %v226_v46, 0.0004427343 }
 0x1d9   :  { %340 = vtanh.f32 %v208_v36 }
 0x1da   :  { %v225_v51 = vmul.f32 %v337_v41, %v224_v45 }
 0x1e2   :  { %v339_v48 = vpop.eup %338 }
 0x1e3   :  { %v341_v49 = vpop.eup %340  ;;  %v222_v50 = vmul.f32 0.6931472, %v339_v48 }
 0x1e4   :  { %v214_v54 = vmul.f32 2.0, %v341_v49 }
 0x1e5   :  { %v228_v53 = vsel %vm227_vm2, %v225_v51, %v222_v50 }
 0x1e6   :  { %v229_v55 = vadd.f32 %v228_v53, %v215_v52 }
 0x1e8   :  { %v231_v56 = vsel %vm230_vm3, %v214_v54, %v229_v55 }
 0x1e9   :  { %232 = vst [vmem:[%s437_s5] sm:$0xff] %v231_v56 }
 0x1ea   :  { %237 = vsyncpa [#allocation3], 1 }

</bundles_post_ra>
